<compile_context>
chip_gen: v6e
topology: v6e:2x2x1
jax: 0.10.0
libtpu: 0.0.40
codegen_flags: <defaults>
</compile_context>

<pallas_src>
import functools

import jax
import jax.numpy as jnp
from jax.experimental import pallas as pl
from jax.experimental.pallas import tpu as pltpu


def _round_up(n: int, m: int) -> int:
    return -(-n // m) * m


# ----------------------------- fused kernel ---------------------------------


def kan_fused_kernel(*refs, n_blocks, degree, has_head, mxu_dtype):
    """Entire KAN forward for one batch tile.

    Ref order: x, (coeffs_t, w_t, b) * n_blocks, [w_out_t, b_out], out
      x        : (TB, D_in)
      coeffs_t : (degree+1, D)      polynomial coefficients, transposed
      w_t      : (D, D_next)        linear weight, transposed
      b        : (1, D_next)
      out      : (TB, D_final)      lane-dense (D_final multiple of 128)
    """
    x_ref = refs[0]
    o_ref = refs[-1]
    p = refs[1:-1]

    h = x_ref[...].astype(jnp.float32)

    i = 0
    for _ in range(n_blocks):
        c_ref, w_ref, b_ref = p[i], p[i + 1], p[i + 2]
        i += 3

        # Load coefficients once; Horner evaluation of sum_d c_d * h**d (f32 on VPU).
        c = c_ref[...]                                        # (degree+1, D)
        if degree >= 1:
            proj = h * c[degree, :][None, :] + c[degree - 1, :][None, :]
            for d in range(degree - 2, -1, -1):
                proj = proj * h + c[d, :][None, :]
        else:
            proj = jnp.ones_like(h) * c[0, :][None, :]

        # MXU matmul: (optionally) bf16 inputs, always f32 accumulation.
        y = jnp.dot(proj.astype(mxu_dtype), w_ref[...].astype(mxu_dtype),
                    preferred_element_type=jnp.float32)
        h = jnp.maximum(y + b_ref[...], 0.0)                  # ReLU
        # TODO(synk): activations other than ReLU and dropout>0 (training-mode RNG)
        #             are not wired; dropout is identity in eval anyway.

    if has_head:
        w_ref, b_ref = p[i], p[i + 1]
        y = jnp.dot(h.astype(mxu_dtype), w_ref[...].astype(mxu_dtype),
                    preferred_element_type=jnp.float32)
        h = y + b_ref[...]

    o_ref[...] = h.astype(o_ref.dtype)


# ----------------------------- wrapper ---------------------------------------


def _resident_spec(shape):
    """Whole-array block with a constant index map -> stays VMEM-resident."""
    n = len(shape)
    return pl.BlockSpec(shape, lambda i: (0,) * n)


@functools.partial(jax.jit, static_argnames=("tb", "mxu_bf16"))
def kan_forward(x, params, *, tb: int = 512, mxu_bf16: bool = True):
    """Fused KAN forward.  x: (B, d_in) or (B, K, d_in) (flattened like the PyTorch module)."""
    if x.ndim == 3:
        b0, k, d = x.shape
        x = x.reshape(b0 * k, d)
    B, d_in = x.shape

    blocks = params["blocks"]
    n_blocks = len(blocks)
    degree = blocks[0]["coeffs_t"].shape[0] - 1
    d_block = blocks[0]["w_t"].shape[1]
    has_head = params["output"] is not None

    # Lane-dense head: pad D_out up to a multiple of 128 with zero columns.
    if has_head:
        d_out = params["output"]["w_t"].shape[1]
        d_out_pad = _round_up(max(d_out, 128), 128)
        w_out = params["output"]["w_t"]
        b_out = params["output"]["b"]
        if d_out_pad != d_out:
            w_out = jnp.pad(w_out, ((0, 0), (0, d_out_pad - d_out)))
            b_out = jnp.pad(b_out, ((0, 0), (0, d_out_pad - d_out)))
        d_final = d_out_pad
    else:
        d_out = d_final = d_block

    # Batch tiling: tile size TB (>=8, multiple of 8); pad rows so TB | padded_B.
    tb = min(tb, _round_up(B, 8))
    padded_B = _round_up(B, tb)
    if padded_B != B:
        x = jnp.pad(x, ((0, padded_B - B), (0, 0)))
    grid = (padded_B // tb,)

    args = [x]
    in_specs = [pl.BlockSpec((tb, d_in), lambda i: (i, 0))]
    for blk in blocks:
        args += [blk["coeffs_t"], blk["w_t"], blk["b"]]
        in_specs += [_resident_spec(blk["coeffs_t"].shape),
                     _resident_spec(blk["w_t"].shape),
                     _resident_spec(blk["b"].shape)]
    if has_head:
        args += [w_out, b_out]
        in_specs += [_resident_spec(w_out.shape), _resident_spec(b_out.shape)]

    kern = functools.partial(
        kan_fused_kernel,
        n_blocks=n_blocks,
        degree=degree,
        has_head=has_head,
        mxu_dtype=jnp.bfloat16 if mxu_bf16 else jnp.float32,
    )

    out = pl.pallas_call(
        kern,
        out_shape=jax.ShapeDtypeStruct((padded_B, d_final), jnp.float32),
        grid=grid,
        in_specs=in_specs,
        out_specs=pl.BlockSpec((tb, d_final), lambda i: (i, 0)),
        compiler_params=pltpu.CompilerParams(
            dimension_semantics=("parallel",),          # 2 TCs on v7x; neutral elsewhere
            vmem_limit_bytes=48 * 1024 * 1024,          # headroom below v7x's 64 MiB
        ),
    )(*args)

    return out[:B, :d_out]


# ----------------------------- params / reference ----------------------------


def init_kan_params(key, d_in, d_out, n_blocks=3, d_block=128, degree=3):
    """Synthetic parameter init; shapes match the PyTorch module (stored transposed)."""
    params = {"blocks": [], "output": None}
    for i in range(n_blocks):
        in_dim = d_in if i == 0 else d_block
        key, k1, k2, k3 = jax.random.split(key, 4)
        coeffs = jax.random.normal(k1, (in_dim, degree + 1), jnp.float32)   # randn, as in torch
        bound = 1.0 / jnp.sqrt(jnp.float32(in_dim))
        w = jax.random.uniform(k2, (d_block, in_dim), jnp.float32, -bound, bound)
        b = jax.random.uniform(k3, (d_block,), jnp.float32, -bound, bound)
        params["blocks"].append({
            "coeffs_t": coeffs.T,                  # (degree+1, in_dim)
            "w_t": w.T,                            # (in_dim, d_block)
            "b": b.reshape(1, d_block),
        })
    if d_out is not None:
        key, k1, k2 = jax.random.split(key, 3)
        bound = 1.0 / jnp.sqrt(jnp.float32(d_block))
        w = jax.random.uniform(k1, (d_out, d_block), jnp.float32, -bound, bound)
        b = jax.random.uniform(k2, (d_out,), jnp.float32, -bound, bound)
        params["output"] = {"w_t": w.T, "b": b.reshape(1, d_out)}
    return params


def kan_forward_ref(x, params, *, mxu_bf16=True):
    """Pure-jnp reference.  Mathematically identical to the PyTorch forward
    (sum_d c_d * x**d == Horner).  It mirrors the kernel's numerics (Horner order,
    bf16 matmul inputs with f32 accumulation when mxu_bf16=True) so the comparison
    isolates the Pallas plumbing rather than mixed-precision rounding."""
    if x.ndim == 3:
        b0, k, d = x.shape
        x = x.reshape(b0 * k, d)
    h = x.astype(jnp.float32)

    def dot(a, w):
        if mxu_bf16:
            a = a.astype(jnp.bfloat16)
            w = w.astype(jnp.bfloat16)
        return jnp.dot(a, w, preferred_element_type=jnp.float32)

    for blk in params["blocks"]:
        c = blk["coeffs_t"]                       # (degree+1, in_dim)
        degree = c.shape[0] - 1
        if degree >= 1:
            proj = h * c[degree][None, :] + c[degree - 1][None, :]
            for d in range(degree - 2, -1, -1):
                proj = proj * h + c[d][None, :]
        else:
            proj = jnp.ones_like(h) * c[0][None, :]
        h = jnp.maximum(dot(proj, blk["w_t"]) + blk["b"], 0.0)
    if params["output"] is not None:
        h = dot(h, params["output"]["w_t"]) + params["output"]["b"]
    return h


# ----------------------------- main ------------------------------------------

if __name__ == "__main__":
    B, D_IN, D_BLOCK, D_OUT, N_BLOCKS, DEGREE = 8, 32, 128, 16, 3, 3

    key = jax.random.PRNGKey(0)
    key, kx = jax.random.split(key)
    x = jax.random.normal(kx, (B, D_IN), jnp.float32)

    params = init_kan_params(key, D_IN, D_OUT, n_blocks=N_BLOCKS,
                             d_block=D_BLOCK, degree=DEGREE)

    # Small-batch run (single tile).
    out = jax.block_until_ready(kan_forward(x, params))
    assert out.shape == (B, D_OUT), out.shape
    ref = kan_forward_ref(x, params)
    scale = float(jnp.maximum(1.0, jnp.max(jnp.abs(ref))))
    max_err = float(jnp.max(jnp.abs(out - ref)))
    assert max_err <= 2e-2 * scale, (max_err, scale)

    # Multi-tile run (exercises batch tiling, row padding of a non-divisible batch,
    # and the parallel grid axis).
    key, kx2 = jax.random.split(key)
    x2 = jax.random.normal(kx2, (300, D_IN), jnp.float32)
    out2 = jax.block_until_ready(kan_forward(x2, params, tb=128))
    assert out2.shape == (300, D_OUT), out2.shape
    ref2 = kan_forward_ref(x2, params)
    scale2 = float(jnp.maximum(1.0, jnp.max(jnp.abs(ref2))))
    max_err2 = float(jnp.max(jnp.abs(out2 - ref2)))
    assert max_err2 <= 2e-2 * scale2, (max_err2, scale2)

    print("KERNEL_OK")
</pallas_src>

<mosaic_0001>
module attributes {stable_mosaic.version = 11 : i64} {
  func.func @kan_fused_kernel(%arg0: i32, %arg1: memref<8x32xf32, #tpu.memory_space<vmem>>, %arg2: memref<4x32xf32, #tpu.memory_space<vmem>>, %arg3: memref<32x128xf32, #tpu.memory_space<vmem>>, %arg4: memref<1x128xf32, #tpu.memory_space<vmem>>, %arg5: memref<4x128xf32, #tpu.memory_space<vmem>>, %arg6: memref<128x128xf32, #tpu.memory_space<vmem>>, %arg7: memref<1x128xf32, #tpu.memory_space<vmem>>, %arg8: memref<4x128xf32, #tpu.memory_space<vmem>>, %arg9: memref<128x128xf32, #tpu.memory_space<vmem>>, %arg10: memref<1x128xf32, #tpu.memory_space<vmem>>, %arg11: memref<128x128xf32, #tpu.memory_space<vmem>>, %arg12: memref<1x128xf32, #tpu.memory_space<vmem>>, %arg13: memref<8x128xf32, #tpu.memory_space<vmem>>) attributes {dimension_semantics = [#tpu.dimension_semantics<parallel>], iteration_bounds = array<i64: 1>, scalar_prefetch = 0 : i64, scratch_operands = 0 : i64, tpu.core_type = #tpu.core_type<tc>, window_params = [{transform_indices = @transform_0, window_bounds = array<i64: 8, 32>}, {pipeline_mode = #tpu.pipeline_mode<synchronous>, transform_indices = @transform_1, window_bounds = array<i64: 4, 32>}, {pipeline_mode = #tpu.pipeline_mode<synchronous>, transform_indices = @transform_2, window_bounds = array<i64: 32, 128>}, {pipeline_mode = #tpu.pipeline_mode<synchronous>, transform_indices = @transform_3, window_bounds = array<i64: 1, 128>}, {pipeline_mode = #tpu.pipeline_mode<synchronous>, transform_indices = @transform_4, window_bounds = array<i64: 4, 128>}, {pipeline_mode = #tpu.pipeline_mode<synchronous>, transform_indices = @transform_5, window_bounds = array<i64: 128, 128>}, {pipeline_mode = #tpu.pipeline_mode<synchronous>, transform_indices = @transform_6, window_bounds = array<i64: 1, 128>}, {pipeline_mode = #tpu.pipeline_mode<synchronous>, transform_indices = @transform_7, window_bounds = array<i64: 4, 128>}, {pipeline_mode = #tpu.pipeline_mode<synchronous>, transform_indices = @transform_8, window_bounds = array<i64: 128, 128>}, {pipeline_mode = #tpu.pipeline_mode<synchronous>, transform_indices = @transform_9, window_bounds = array<i64: 1, 128>}, {pipeline_mode = #tpu.pipeline_mode<synchronous>, transform_indices = @transform_10, window_bounds = array<i64: 128, 128>}, {pipeline_mode = #tpu.pipeline_mode<synchronous>, transform_indices = @transform_11, window_bounds = array<i64: 1, 128>}, {transform_indices = @transform_12, window_bounds = array<i64: 8, 128>}]} {
    %c0 = arith.constant 0 : index
    %c0_0 = arith.constant 0 : index
    %0 = vector.load %arg1[%c0, %c0_0] : memref<8x32xf32, #tpu.memory_space<vmem>>, vector<8x32xf32>
    %c0_1 = arith.constant 0 : index
    %c0_2 = arith.constant 0 : index
    %1 = vector.load %arg2[%c0_1, %c0_2] : memref<4x32xf32, #tpu.memory_space<vmem>>, vector<4x32xf32>
    %2 = vector.extract_strided_slice %1 {offsets = [3, 0], sizes = [1, 32], strides = [1, 1]} : vector<4x32xf32> to vector<1x32xf32>
    %3 = vector.shape_cast %2 : vector<1x32xf32> to vector<32xf32>
    %4 = vector.shape_cast %3 : vector<32xf32> to vector<1x32xf32>
    %5 = vector.broadcast %4 : vector<1x32xf32> to vector<8x32xf32>
    %6 = arith.mulf %0, %5 : vector<8x32xf32>
    %7 = vector.extract_strided_slice %1 {offsets = [2, 0], sizes = [1, 32], strides = [1, 1]} : vector<4x32xf32> to vector<1x32xf32>
    %8 = vector.shape_cast %7 : vector<1x32xf32> to vector<32xf32>
    %9 = vector.shape_cast %8 : vector<32xf32> to vector<1x32xf32>
    %10 = vector.broadcast %9 : vector<1x32xf32> to vector<8x32xf32>
    %11 = arith.addf %6, %10 : vector<8x32xf32>
    %12 = arith.mulf %11, %0 : vector<8x32xf32>
    %13 = vector.extract_strided_slice %1 {offsets = [1, 0], sizes = [1, 32], strides = [1, 1]} : vector<4x32xf32> to vector<1x32xf32>
    %14 = vector.shape_cast %13 : vector<1x32xf32> to vector<32xf32>
    %15 = vector.shape_cast %14 : vector<32xf32> to vector<1x32xf32>
    %16 = vector.broadcast %15 : vector<1x32xf32> to vector<8x32xf32>
    %17 = arith.addf %12, %16 : vector<8x32xf32>
    %18 = arith.mulf %17, %0 : vector<8x32xf32>
    %19 = vector.extract_strided_slice %1 {offsets = [0, 0], sizes = [1, 32], strides = [1, 1]} : vector<4x32xf32> to vector<1x32xf32>
    %20 = vector.shape_cast %19 : vector<1x32xf32> to vector<32xf32>
    %21 = vector.shape_cast %20 : vector<32xf32> to vector<1x32xf32>
    %22 = vector.broadcast %21 : vector<1x32xf32> to vector<8x32xf32>
    %23 = arith.addf %18, %22 : vector<8x32xf32>
    %24 = arith.truncf %23 : vector<8x32xf32> to vector<8x32xbf16>
    %c0_3 = arith.constant 0 : index
    %c0_4 = arith.constant 0 : index
    %25 = vector.load %arg3[%c0_3, %c0_4] : memref<32x128xf32, #tpu.memory_space<vmem>>, vector<32x128xf32>
    %26 = arith.truncf %25 : vector<32x128xf32> to vector<32x128xbf16>
    %cst = arith.constant dense<0.000000e+00> : vector<8x128xf32>
    %27 = tpu.matmul %24, %26, %cst {dimension_numbers = #tpu.dot_dimension_numbers<[1], [0], [0], [1], [0, 0, 1, 1], [], []>} : vector<8x32xbf16>, vector<32x128xbf16>, vector<8x128xf32> -> vector<8x128xf32>
    %c0_5 = arith.constant 0 : index
    %c0_6 = arith.constant 0 : index
    %28 = vector.load %arg4[%c0_5, %c0_6] : memref<1x128xf32, #tpu.memory_space<vmem>>, vector<1x128xf32>
    %29 = vector.broadcast %28 : vector<1x128xf32> to vector<8x128xf32>
    %30 = arith.addf %27, %29 : vector<8x128xf32>
    %cst_7 = arith.constant 0.000000e+00 : f32
    %31 = vector.broadcast %cst_7 : f32 to vector<8x128xf32>
    %32 = arith.maximumf %30, %31 : vector<8x128xf32>
    %c0_8 = arith.constant 0 : index
    %c0_9 = arith.constant 0 : index
    %33 = vector.load %arg5[%c0_8, %c0_9] : memref<4x128xf32, #tpu.memory_space<vmem>>, vector<4x128xf32>
    %34 = vector.extract_strided_slice %33 {offsets = [3, 0], sizes = [1, 128], strides = [1, 1]} : vector<4x128xf32> to vector<1x128xf32>
    %35 = vector.shape_cast %34 : vector<1x128xf32> to vector<128xf32>
    %36 = vector.shape_cast %35 : vector<128xf32> to vector<1x128xf32>
    %37 = vector.broadcast %36 : vector<1x128xf32> to vector<8x128xf32>
    %38 = arith.mulf %32, %37 : vector<8x128xf32>
    %39 = vector.extract_strided_slice %33 {offsets = [2, 0], sizes = [1, 128], strides = [1, 1]} : vector<4x128xf32> to vector<1x128xf32>
    %40 = vector.shape_cast %39 : vector<1x128xf32> to vector<128xf32>
    %41 = vector.shape_cast %40 : vector<128xf32> to vector<1x128xf32>
    %42 = vector.broadcast %41 : vector<1x128xf32> to vector<8x128xf32>
    %43 = arith.addf %38, %42 : vector<8x128xf32>
    %44 = arith.mulf %43, %32 : vector<8x128xf32>
    %45 = vector.extract_strided_slice %33 {offsets = [1, 0], sizes = [1, 128], strides = [1, 1]} : vector<4x128xf32> to vector<1x128xf32>
    %46 = vector.shape_cast %45 : vector<1x128xf32> to vector<128xf32>
    %47 = vector.shape_cast %46 : vector<128xf32> to vector<1x128xf32>
    %48 = vector.broadcast %47 : vector<1x128xf32> to vector<8x128xf32>
    %49 = arith.addf %44, %48 : vector<8x128xf32>
    %50 = arith.mulf %49, %32 : vector<8x128xf32>
    %51 = vector.extract_strided_slice %33 {offsets = [0, 0], sizes = [1, 128], strides = [1, 1]} : vector<4x128xf32> to vector<1x128xf32>
    %52 = vector.shape_cast %51 : vector<1x128xf32> to vector<128xf32>
    %53 = vector.shape_cast %52 : vector<128xf32> to vector<1x128xf32>
    %54 = vector.broadcast %53 : vector<1x128xf32> to vector<8x128xf32>
    %55 = arith.addf %50, %54 : vector<8x128xf32>
    %56 = arith.truncf %55 : vector<8x128xf32> to vector<8x128xbf16>
    %c0_10 = arith.constant 0 : index
    %c0_11 = arith.constant 0 : index
    %57 = vector.load %arg6[%c0_10, %c0_11] : memref<128x128xf32, #tpu.memory_space<vmem>>, vector<128x128xf32>
    %58 = arith.truncf %57 : vector<128x128xf32> to vector<128x128xbf16>
    %cst_12 = arith.constant dense<0.000000e+00> : vector<8x128xf32>
    %59 = tpu.matmul %56, %58, %cst_12 {dimension_numbers = #tpu.dot_dimension_numbers<[1], [0], [0], [1], [0, 0, 1, 1], [], []>} : vector<8x128xbf16>, vector<128x128xbf16>, vector<8x128xf32> -> vector<8x128xf32>
    %c0_13 = arith.constant 0 : index
    %c0_14 = arith.constant 0 : index
    %60 = vector.load %arg7[%c0_13, %c0_14] : memref<1x128xf32, #tpu.memory_space<vmem>>, vector<1x128xf32>
    %61 = vector.broadcast %60 : vector<1x128xf32> to vector<8x128xf32>
    %62 = arith.addf %59, %61 : vector<8x128xf32>
    %cst_15 = arith.constant 0.000000e+00 : f32
    %63 = vector.broadcast %cst_15 : f32 to vector<8x128xf32>
    %64 = arith.maximumf %62, %63 : vector<8x128xf32>
    %c0_16 = arith.constant 0 : index
    %c0_17 = arith.constant 0 : index
    %65 = vector.load %arg8[%c0_16, %c0_17] : memref<4x128xf32, #tpu.memory_space<vmem>>, vector<4x128xf32>
    %66 = vector.extract_strided_slice %65 {offsets = [3, 0], sizes = [1, 128], strides = [1, 1]} : vector<4x128xf32> to vector<1x128xf32>
    %67 = vector.shape_cast %66 : vector<1x128xf32> to vector<128xf32>
    %68 = vector.shape_cast %67 : vector<128xf32> to vector<1x128xf32>
    %69 = vector.broadcast %68 : vector<1x128xf32> to vector<8x128xf32>
    %70 = arith.mulf %64, %69 : vector<8x128xf32>
    %71 = vector.extract_strided_slice %65 {offsets = [2, 0], sizes = [1, 128], strides = [1, 1]} : vector<4x128xf32> to vector<1x128xf32>
    %72 = vector.shape_cast %71 : vector<1x128xf32> to vector<128xf32>
    %73 = vector.shape_cast %72 : vector<128xf32> to vector<1x128xf32>
    %74 = vector.broadcast %73 : vector<1x128xf32> to vector<8x128xf32>
    %75 = arith.addf %70, %74 : vector<8x128xf32>
    %76 = arith.mulf %75, %64 : vector<8x128xf32>
    %77 = vector.extract_strided_slice %65 {offsets = [1, 0], sizes = [1, 128], strides = [1, 1]} : vector<4x128xf32> to vector<1x128xf32>
    %78 = vector.shape_cast %77 : vector<1x128xf32> to vector<128xf32>
    %79 = vector.shape_cast %78 : vector<128xf32> to vector<1x128xf32>
    %80 = vector.broadcast %79 : vector<1x128xf32> to vector<8x128xf32>
    %81 = arith.addf %76, %80 : vector<8x128xf32>
    %82 = arith.mulf %81, %64 : vector<8x128xf32>
    %83 = vector.extract_strided_slice %65 {offsets = [0, 0], sizes = [1, 128], strides = [1, 1]} : vector<4x128xf32> to vector<1x128xf32>
    %84 = vector.shape_cast %83 : vector<1x128xf32> to vector<128xf32>
    %85 = vector.shape_cast %84 : vector<128xf32> to vector<1x128xf32>
    %86 = vector.broadcast %85 : vector<1x128xf32> to vector<8x128xf32>
    %87 = arith.addf %82, %86 : vector<8x128xf32>
    %88 = arith.truncf %87 : vector<8x128xf32> to vector<8x128xbf16>
    %c0_18 = arith.constant 0 : index
    %c0_19 = arith.constant 0 : index
    %89 = vector.load %arg9[%c0_18, %c0_19] : memref<128x128xf32, #tpu.memory_space<vmem>>, vector<128x128xf32>
    %90 = arith.truncf %89 : vector<128x128xf32> to vector<128x128xbf16>
    %cst_20 = arith.constant dense<0.000000e+00> : vector<8x128xf32>
    %91 = tpu.matmul %88, %90, %cst_20 {dimension_numbers = #tpu.dot_dimension_numbers<[1], [0], [0], [1], [0, 0, 1, 1], [], []>} : vector<8x128xbf16>, vector<128x128xbf16>, vector<8x128xf32> -> vector<8x128xf32>
    %c0_21 = arith.constant 0 : index
    %c0_22 = arith.constant 0 : index
    %92 = vector.load %arg10[%c0_21, %c0_22] : memref<1x128xf32, #tpu.memory_space<vmem>>, vector<1x128xf32>
    %93 = vector.broadcast %92 : vector<1x128xf32> to vector<8x128xf32>
    %94 = arith.addf %91, %93 : vector<8x128xf32>
    %cst_23 = arith.constant 0.000000e+00 : f32
    %95 = vector.broadcast %cst_23 : f32 to vector<8x128xf32>
    %96 = arith.maximumf %94, %95 : vector<8x128xf32>
    %97 = arith.truncf %96 : vector<8x128xf32> to vector<8x128xbf16>
    %c0_24 = arith.constant 0 : index
    %c0_25 = arith.constant 0 : index
    %98 = vector.load %arg11[%c0_24, %c0_25] : memref<128x128xf32, #tpu.memory_space<vmem>>, vector<128x128xf32>
    %99 = arith.truncf %98 : vector<128x128xf32> to vector<128x128xbf16>
    %cst_26 = arith.constant dense<0.000000e+00> : vector<8x128xf32>
    %100 = tpu.matmul %97, %99, %cst_26 {dimension_numbers = #tpu.dot_dimension_numbers<[1], [0], [0], [1], [0, 0, 1, 1], [], []>} : vector<8x128xbf16>, vector<128x128xbf16>, vector<8x128xf32> -> vector<8x128xf32>
    %c0_27 = arith.constant 0 : index
    %c0_28 = arith.constant 0 : index
    %101 = vector.load %arg12[%c0_27, %c0_28] : memref<1x128xf32, #tpu.memory_space<vmem>>, vector<1x128xf32>
    %102 = vector.broadcast %101 : vector<1x128xf32> to vector<8x128xf32>
    %103 = arith.addf %100, %102 : vector<8x128xf32>
    %c0_29 = arith.constant 0 : index
    %c0_30 = arith.constant 0 : index
    %104 = vector.load %arg13[%c0_29, %c0_30] : memref<8x128xf32, #tpu.memory_space<vmem>>, vector<8x128xf32>
    tpu.vector_store %arg13[%c0_29, %c0_30], %103 {strides = array<i32>} : memref<8x128xf32, #tpu.memory_space<vmem>>, vector<8x128xf32>,
    return
  }
  func.func @transform_0(%arg0: i32) -> (i32, i32) {
    %c0_i32 = arith.constant 0 : i32
    %c0_i32_0 = arith.constant 0 : i32
    return %arg0, %c0_i32 : i32, i32
  }
  func.func @transform_1(%arg0: i32) -> (i32, i32) {
    %c0_i32 = arith.constant 0 : i32
    %c0_i32_0 = arith.constant 0 : i32
    %c0_i32_1 = arith.constant 0 : i32
    return %c0_i32, %c0_i32_0 : i32, i32
  }
  func.func @transform_2(%arg0: i32) -> (i32, i32) {
    %c0_i32 = arith.constant 0 : i32
    %c0_i32_0 = arith.constant 0 : i32
    %c0_i32_1 = arith.constant 0 : i32
    return %c0_i32, %c0_i32_0 : i32, i32
  }
  func.func @transform_3(%arg0: i32) -> (i32, i32) {
    %c0_i32 = arith.constant 0 : i32
    %c0_i32_0 = arith.constant 0 : i32
    %c0_i32_1 = arith.constant 0 : i32
    return %c0_i32, %c0_i32_0 : i32, i32
  }
  func.func @transform_4(%arg0: i32) -> (i32, i32) {
    %c0_i32 = arith.constant 0 : i32
    %c0_i32_0 = arith.constant 0 : i32
    %c0_i32_1 = arith.constant 0 : i32
    return %c0_i32, %c0_i32_0 : i32, i32
  }
  func.func @transform_5(%arg0: i32) -> (i32, i32) {
    %c0_i32 = arith.constant 0 : i32
    %c0_i32_0 = arith.constant 0 : i32
    %c0_i32_1 = arith.constant 0 : i32
    return %c0_i32, %c0_i32_0 : i32, i32
  }
  func.func @transform_6(%arg0: i32) -> (i32, i32) {
    %c0_i32 = arith.constant 0 : i32
    %c0_i32_0 = arith.constant 0 : i32
    %c0_i32_1 = arith.constant 0 : i32
    return %c0_i32, %c0_i32_0 : i32, i32
  }
  func.func @transform_7(%arg0: i32) -> (i32, i32) {
    %c0_i32 = arith.constant 0 : i32
    %c0_i32_0 = arith.constant 0 : i32
    %c0_i32_1 = arith.constant 0 : i32
    return %c0_i32, %c0_i32_0 : i32, i32
  }
  func.func @transform_8(%arg0: i32) -> (i32, i32) {
    %c0_i32 = arith.constant 0 : i32
    %c0_i32_0 = arith.constant 0 : i32
    %c0_i32_1 = arith.constant 0 : i32
    return %c0_i32, %c0_i32_0 : i32, i32
  }
  func.func @transform_9(%arg0: i32) -> (i32, i32) {
    %c0_i32 = arith.constant 0 : i32
    %c0_i32_0 = arith.constant 0 : i32
    %c0_i32_1 = arith.constant 0 : i32
    return %c0_i32, %c0_i32_0 : i32, i32
  }
  func.func @transform_10(%arg0: i32) -> (i32, i32) {
    %c0_i32 = arith.constant 0 : i32
    %c0_i32_0 = arith.constant 0 : i32
    %c0_i32_1 = arith.constant 0 : i32
    return %c0_i32, %c0_i32_0 : i32, i32
  }
  func.func @transform_11(%arg0: i32) -> (i32, i32) {
    %c0_i32 = arith.constant 0 : i32
    %c0_i32_0 = arith.constant 0 : i32
    %c0_i32_1 = arith.constant 0 : i32
    return %c0_i32, %c0_i32_0 : i32, i32
  }
  func.func @transform_12(%arg0: i32) -> (i32, i32) {
    %c0_i32 = arith.constant 0 : i32
    %c0_i32_0 = arith.constant 0 : i32
    return %arg0, %c0_i32 : i32, i32
  }
}

</mosaic_0001>

<bundles_post_ra>
// kernel: kan_forward.1
= control target key start
LH: loop header
LB: loop body
LE: loop exit
PB: predicated region body
PF: predicated region fallthrough
CT: control target
= control target key end

     0   :  { %v45_v3 = vlaneseq  ;;  %v533_v4 = vmov 0.0   ;;  %vm534_vm0 = vmmov 0   ;;  %s838_s0 = inlined_call_operand.vmem [shape: f32[8,32], index: 0, kind: input, shape index: {}]   ;;  %s839_s1 = inlined_call_operand.vmem [shape: f32[4,32], index: 1, kind: input, shape index: {}]   ;;  %s840_s2 = inlined_call_operand.vmem [shape: f32[32,128], index: 2, kind: input, shape index: {}]   ;;  %s841_s3 = inlined_call_operand.vmem [shape: f32[1,128], index: 3, kind: input, shape index: {}]   ;;  %s842_s4 = inlined_call_operand.vmem [shape: f32[4,128], index: 4, kind: input, shape index: {}]   ;;  %s843_s5 = inlined_call_operand.vmem [shape: f32[128,128], index: 5, kind: input, shape index: {}]   ;;  %s844_s6 = inlined_call_operand.vmem [shape: f32[1,128], index: 6, kind: input, shape index: {}]   ;;  %s845_s7 = inlined_call_operand.vmem [shape: f32[4,128], index: 7, kind: input, shape index: {}]   ;;  %s846_s8 = inlined_call_operand.vmem [shape: f32[128,128], index: 8, kind: input, shape index: {}]   ;;  %s847_s9 = inlined_call_operand.vmem [shape: f32[1,128], index: 9, kind: input, shape index: {}]   ;;  %s848_s10 = inlined_call_operand.vmem [shape: f32[128,128], index: 10, kind: input, shape index: {}]   ;;  %s849_s11 = inlined_call_operand.vmem [shape: f32[1,128], index: 11, kind: input, shape index: {}]   ;;  %s850_s12 = inlined_call_operand.hbm [shape: f32[8,128], index: 12, kind: output, shape index: {}]  }
   0x1   :  { %v70_v0 = vld [vmem:[%s840_s2 + $0x10] sm:$0xff]  ;;  %v71_v1 = vld [vmem:[%s840_s2 + $0x18] sm:$0xff]  ;;  %v68_v2 = vld [vmem:[%s840_s2] sm:$0xff]  ;;  %440 = vmatprep.subr.bf16.mxu0 %v533_v4  ;;  %444 = vmatprep.mubr.msk.bf16.mxu0 %vm534_vm0, %v533_v4 }
   0x2   :  { %v73_v5 = vpack.c.bf16 %v71_v1, %v70_v0  ;;  %v69_v6 = vld [vmem:[%s840_s2 + $0x8] sm:$0xff]  ;;  %v46_v7 = vshrl.u32 %v45_v3, 7  ;;  %448 = vmatprep.subr.bf16.mxu1 %v533_v4  ;;  %v164_v8 = vld [vmem:[%s843_s5 + $0x70] sm:$0xff]  ;;  %v165_v9 = vld [vmem:[%s843_s5 + $0x78] sm:$0xff]  ;;  %464 = vmatprep.mubr.msk.bf16.mxu1 %vm534_vm0, %v533_v4 }
   0x3   :  { %v162_v10 = vld [vmem:[%s843_s5 + $0x60] sm:$0xff]  ;;  %v72_v11 = vpack.c.bf16 %v69_v6, %v68_v2  ;;  %v173_v13 = vpack.c.bf16 %v165_v9, %v164_v8  ;;  %v163_v14 = vld [vmem:[%s843_s5 + $0x68] sm:$0xff] }
   0x4   :  { %441 = vmatpush3.bf16.msra.mxu0 %v73_v5  ;;  %v44_v12 = vld [vmem:[%s839_s1] sm:$0xf]  ;;  %v635_v15 = vsub.s32 3, %v46_v7  ;;  %v637_v16 = vsub.s32 2, %v46_v7  ;;  %v172_v18 = vpack.c.bf16 %v163_v14, %v162_v10 }
   0x5   :  { %442 = vmatprep.subr.bf16.mxu0 %v533_v4  ;;  %v43_v17 = vld [vmem:[%s838_s0] sm:$0xff]  ;;  %449 = vmatpush3.bf16.msra.mxu1 %v173_v13 }
   0x6   :  { %17 = vsyncpa [#allocation3], 0  ;;  %v48_v19 = vrot.slane %v44_v12, %v635_v15  ;;  %v53_v20 = vrot.slane %v44_v12, %v637_v16  ;;  %v644_v21 = vsub.s32 1, %v46_v7  ;;  %450 = vmatprep.subr.bf16.mxu1 %v533_v4  ;;  %v160_v22 = vld [vmem:[%s843_s5 + $0x50] sm:$0xff]  ;;  %v161_v23 = vld [vmem:[%s843_s5 + $0x58] sm:$0xff]  ;;  %v655_v28 = vsub.s32 0, %v46_v7 }
   0x7   :  { %v171_v25 = vpack.c.bf16 %v161_v23, %v160_v22  ;;  %vm81_vm1 = vcmask 261120   ;;  %v158_v35 = vld [vmem:[%s843_s5 + $0x40] sm:$0xff]  ;;  %v159_v36 = vld [vmem:[%s843_s5 + $0x48] sm:$0xff]  ;;  %v156_v38 = vld [vmem:[%s843_s5 + $0x30] sm:$0xff]  ;;  %s535_s24 = smov [#allocation2]  }
   0x8   :  { %443 = vmatpush3.bf16.msra.mxu0 %v72_v11  ;;  %v49_v24 = vmul.f32 %v48_v19, %v43_v17  ;;  %v59_v27 = vrot.slane %v44_v12, %v644_v21  ;;  %v65_v31 = vrot.slane %v44_v12, %v655_v28  ;;  %v170_v37 = vpack.c.bf16 %v159_v36, %v158_v35  ;;  %v157_v39 = vld [vmem:[%s843_s5 + $0x38] sm:$0xff]  ;;  %v154_v41 = vld [vmem:[%s843_s5 + $0x20] sm:$0xff]  ;;  %v155_v42 = vld [vmem:[%s843_s5 + $0x28] sm:$0xff] }
   0x9   :  { %468 = vmatprep.subr.bf16.mxu0 %v533_v4  ;;  %451 = vmatpush3.bf16.msra.mxu1 %v172_v18  ;;  %v169_v40 = vpack.c.bf16 %v157_v39, %v156_v38  ;;  %v168_v43 = vpack.c.bf16 %v155_v42, %v154_v41  ;;  %v152_v44 = vld [vmem:[%s843_s5 + $0x10] sm:$0xff]  ;;  %v153_v45 = vld [vmem:[%s843_s5 + $0x18] sm:$0xff]  ;;  %v150_v47 = vld [vmem:[%s843_s5] sm:$0xff] }
   0xa   :  { %v54_v26 = vadd.f32 %v53_v20, %v49_v24  ;;  %452 = vmatprep.subr.bf16.mxu1 %v533_v4  ;;  %v167_v46 = vpack.c.bf16 %v153_v45, %v152_v44  ;;  %v151_v48 = vld [vmem:[%s843_s5 + $0x8] sm:$0xff]  ;;  %v260_v50 = vld [vmem:[%s846_s8 + $0x70] sm:$0xff]  ;;  %v261_v51 = vld [vmem:[%s846_s8 + $0x78] sm:$0xff] }
   0xb   :  { %v166_v49 = vpack.c.bf16 %v151_v48, %v150_v47  ;;  %v258_v52 = vld [vmem:[%s846_s8 + $0x60] sm:$0xff]  ;;  %v269_v53 = vpack.c.bf16 %v261_v51, %v260_v50  ;;  %v259_v54 = vld [vmem:[%s846_s8 + $0x68] sm:$0xff]  ;;  %v256_v56 = vld [vmem:[%s846_s8 + $0x50] sm:$0xff] }
   0xc   :  { %v55_v29 = vmul.f32 %v54_v26, %v43_v17  ;;  %v268_v55 = vpack.c.bf16 %v259_v54, %v258_v52  ;;  %v257_v57 = vld [vmem:[%s846_s8 + $0x58] sm:$0xff]  ;;  %v405_v59 = vld [vmem:[%s841_s3] ss:$0 sm:$0xff]  ;;  %v255_v18 = vld [vmem:[%s846_s8 + $0x48] sm:$0xff] }
   0xd   :  { %453 = vmatpush3.bf16.msra.mxu1 %v171_v25  ;;  %v267_v58 = vpack.c.bf16 %v257_v57, %v256_v56  ;;  %v126_v60 = vld [vmem:[%s842_s4] sm:$0xf]  ;;  %v252_v20 = vld [vmem:[%s846_s8 + $0x30] sm:$0xff]  ;;  %v253_v22 = vld [vmem:[%s846_s8 + $0x38] sm:$0xff] }
   0xe   :  { %v60_v30 = vadd.f32 %v59_v27, %v55_v29  ;;  %454 = vmatprep.subr.bf16.mxu1 %v533_v4  ;;  %v130_v63 = vrot.slane %v126_v60, %v635_v15  ;;  %v135_v2 = vrot.slane %v126_v60, %v637_v16  ;;  %v141_v8 = vrot.slane %v126_v60, %v644_v21  ;;  %v250_v24 = vld [vmem:[%s846_s8 + $0x20] sm:$0xff]  ;;  %v251_v25 = vld [vmem:[%s846_s8 + $0x28] sm:$0xff]  ;;  %v248_v27 = vld [vmem:[%s846_s8 + $0x10] sm:$0xff] }
   0xf   :  { %v147_v11 = vrot.slane %v126_v60, %v655_v28  ;;  %v265_v23 = vpack.c.bf16 %v253_v22, %v252_v20  ;;  %v264_v26 = vpack.c.bf16 %v251_v25, %v250_v24  ;;  %v249_v29 = vld [vmem:[%s846_s8 + $0x18] sm:$0xff]  ;;  %v331_v36 = vld [vmem:[%s848_s10 + $0x60] sm:$0xff]  ;;  %v332_v38 = vld [vmem:[%s848_s10 + $0x68] sm:$0xff] }
  0x10   :  { %v61_v32 = vmul.f32 %v60_v30, %v43_v17  ;;  %v254_v17 = vld [vmem:[%s846_s8 + $0x40] sm:$0xff]  ;;  %v263_v30 = vpack.c.bf16 %v249_v29, %v248_v27  ;;  %v334_v35 = vld [vmem:[%s848_s10 + $0x78] sm:$0xff]  ;;  %v341_v39 = vpack.c.bf16 %v332_v38, %v331_v36  ;;  %v328_v44 = vld [vmem:[%s848_s10 + $0x48] sm:$0xff] }
  0x11   :  { %455 = vmatpush3.bf16.msra.mxu1 %v170_v37  ;;  %v266_v19 = vpack.c.bf16 %v255_v18, %v254_v17  ;;  %v330_v41 = vld [vmem:[%s848_s10 + $0x58] sm:$0xff]  ;;  %v324_v50 = vld [vmem:[%s848_s10 + $0x28] sm:$0xff]  ;;  %v407_v52 = vld [vmem:[%s844_s6] ss:$0 sm:$0xff] }
  0x12   :  { %v66_v33 = vadd.f32 %v65_v31, %v61_v32  ;;  %456 = vmatprep.subr.bf16.mxu1 %v533_v4  ;;  %v246_v31 = vld [vmem:[%s846_s8] sm:$0xff]  ;;  %v247_v32 = vld [vmem:[%s846_s8 + $0x8] sm:$0xff]  ;;  %v326_v47 = vld [vmem:[%s848_s10 + $0x38] sm:$0xff] }
  0x14   :  { %v67_v34 = vpack.c.bf16 %v66_v33, %v66_v33  ;;  %v262_v33 = vpack.c.bf16 %v247_v32, %v246_v31 }
  0x15   :  { %457 = vmatpush3.bf16.msra.mxu1 %v169_v40  ;;  %v329_v40 = vld [vmem:[%s848_s10 + $0x50] sm:$0xff] }
  0x16   :  { %445 = vmatmul.mubr.msk.bf16.vlgmr.msra.gmra.mxu0 %vm81_vm1, %v67_v34  ;;  %458 = vmatprep.subr.bf16.mxu1 %v533_v4  ;;  %v333_v34 = vld [vmem:[%s848_s10 + $0x70] sm:$0xff]  ;;  %v340_v42 = vpack.c.bf16 %v330_v41, %v329_v40 }
  0x17   :  { %484 = vmatprep.mubr.msk.bf16.mxu0 %vm534_vm0, %v533_v4  ;;  %469 = vmatpush3.bf16.msra.mxu0 %v269_v53  ;;  %v342_v37 = vpack.c.bf16 %v334_v35, %v333_v34  ;;  %v222_v53 = vld [vmem:[%s845_s7] sm:$0xf] }
  0x18   :  { %470 = vmatprep.subr.bf16.mxu0 %v533_v4  ;;  %v226_v56 = vrot.slane %v222_v53, %v635_v15  ;;  %v321_v15 = vld [vmem:[%s848_s10 + $0x10] sm:$0xff] }
  0x19   :  { %459 = vmatpush3.bf16.msra.mxu1 %v168_v43  ;;  %v327_v43 = vld [vmem:[%s848_s10 + $0x40] sm:$0xff] }
  0x1a   :  { %460 = vmatprep.subr.bf16.mxu1 %v533_v4  ;;  %v339_v45 = vpack.c.bf16 %v328_v44, %v327_v43 }
  0x1b   :  { %471 = vmatpush3.bf16.msra.mxu0 %v268_v55 }
  0x1c   :  { %472 = vmatprep.subr.bf16.mxu0 %v533_v4 }
  0x1d   :  { %461 = vmatpush3.bf16.msra.mxu1 %v167_v46  ;;  %v325_v46 = vld [vmem:[%s848_s10 + $0x30] sm:$0xff] }
  0x1e   :  { %462 = vmatprep.subr.bf16.mxu1 %v533_v4  ;;  %v338_v48 = vpack.c.bf16 %v326_v47, %v325_v46 }
  0x1f   :  { %473 = vmatpush3.bf16.msra.mxu0 %v267_v58 }
  0x20   :  { %474 = vmatprep.subr.bf16.mxu0 %v533_v4 }
  0x21   :  { %463 = vmatpush3.bf16.msra.mxu1 %v166_v49  ;;  %v323_v49 = vld [vmem:[%s848_s10 + $0x20] sm:$0xff] }
  0x22   :  { %488 = vmatprep.subr.bf16.mxu1 %v533_v4  ;;  %v337_v51 = vpack.c.bf16 %v324_v50, %v323_v49 }
  0x23   :  { %475 = vmatpush3.bf16.msra.mxu0 %v266_v19  ;;  %v409_v19 = vld [vmem:[%s849_s11] ss:$0 sm:$0xff] }
  0x24   :  { %476 = vmatprep.subr.bf16.mxu0 %v533_v4 }
  0x27   :  { %477 = vmatpush3.bf16.msra.mxu0 %v265_v23 }
  0x28   :  { %478 = vmatprep.subr.bf16.mxu0 %v533_v4 }
  0x2b   :  { %479 = vmatpush3.bf16.msra.mxu0 %v264_v26 }
  0x2c   :  { %480 = vmatprep.subr.bf16.mxu0 %v533_v4 }
  0x2f   :  { %481 = vmatpush3.bf16.msra.mxu0 %v263_v30 }
  0x30   :  { %482 = vmatprep.subr.bf16.mxu0 %v533_v4 }
  0x33   :  { %483 = vmatpush3.bf16.msra.mxu0 %v262_v33 }
  0xd6   :  { %v119_v61 = vpop.f32.mrf.mxu0 }
  0xd7   :  { %v120_v62 = vadd.f32 %v405_v59, %v119_v61  ;;  %v231_v59 = vrot.slane %v222_v53, %v637_v16  ;;  %v322_v16 = vld [vmem:[%s848_s10 + $0x18] sm:$0xff] }
  0xd8   :  { %v446_v0 = vpop.f32.mrf.mxu0 }
  0xd9   :  { %v125_v1 = vmax.f32 %v120_v62, 0.0  ;;  %v237_v0 = vrot.slane %v222_v53, %v644_v21  ;;  %v319_v21 = vld [vmem:[%s848_s10] sm:$0xff] }
  0xda   :  { %v122_v3 = vpop.f32.mrf.mxu0 }
  0xdb   :  { %v131_v5 = vmul.f32 %v130_v63, %v125_v1  ;;  %v243_v3 = vrot.slane %v222_v53, %v655_v28  ;;  %v320_v28 = vld [vmem:[%s848_s10 + $0x8] sm:$0xff]  ;;  %s397_s10 = sshll.u32 %s535_s24, 4  ;;  %s398_s10 = int_to_ptr.vmem [resolvable:$true] %s397_s10 }
  0xdc   :  { %v447_v6 = vpop.f32.mrf.mxu0  ;;  %p516_p1 = scmp.lt.s32.totalorder %s398_s10, %s398_s10 }
  0xdd   :  { %v136_v7 = vadd.f32 %v135_v2, %v131_v5 }
  0xdf   :  { %v137_v9 = vmul.f32 %v136_v7, %v125_v1 }
  0xe1   :  { %v142_v10 = vadd.f32 %v141_v8, %v137_v9  ;;  %v336_v8 = vpack.c.bf16 %v322_v16, %v321_v15  ;;  %v335_v9 = vpack.c.bf16 %v320_v28, %v319_v21 }
  0xe3   :  { %v143_v12 = vmul.f32 %v142_v10, %v125_v1  ;;  %v408_v10 = vld [vmem:[%s847_s9] ss:$0 sm:$0xff]  ;;  %s511_s9 = scalar_lea.vmem %s398_s10, 128 }
  0xe4   :  { %p512_p0 = scmp.ne.s32.totalorder %s398_s10, %s511_s9  ;;  %p517_p2 = scmp.lt.s32.totalorder %s511_s9, %s511_s9 }
  0xe5   :  { %v148_v13 = vadd.f32 %v147_v11, %v143_v12 }
  0xe6   :  { %p518_p3 = por %p517_p2, %p516_p1 }
  0xe7   :  { %v149_v14 = vpack.c.bf16 %v148_v13, %v148_v13 }
  0xe8   :  { %p519_p4 = pnand %p518_p3, %p512_p0 }
  0xe9   :  { %465 = vmatmul.mubr.bf16.vlgmr.msra.gmra.mxu1 %v149_v14 }
  0xea   :  { %504 = vmatprep.mubr.msk.bf16.mxu1 %vm534_vm0, %v533_v4  ;;  %489 = vmatpush3.bf16.msra.mxu1 %v342_v37 }
  0xeb   :  { %490 = vmatprep.subr.bf16.mxu1 %v533_v4 }
  0xee   :  { %491 = vmatpush3.bf16.msra.mxu1 %v341_v39 }
  0xef   :  { %492 = vmatprep.subr.bf16.mxu1 %v533_v4 }
  0xf2   :  { %493 = vmatpush3.bf16.msra.mxu1 %v340_v42 }
  0xf3   :  { %494 = vmatprep.subr.bf16.mxu1 %v533_v4 }
  0xf6   :  { %495 = vmatpush3.bf16.msra.mxu1 %v339_v45 }
  0xf7   :  { %496 = vmatprep.subr.bf16.mxu1 %v533_v4 }
  0xfa   :  { %497 = vmatpush3.bf16.msra.mxu1 %v338_v48 }
  0xfb   :  { %498 = vmatprep.subr.bf16.mxu1 %v533_v4 }
  0xfe   :  { %499 = vmatpush3.bf16.msra.mxu1 %v337_v51 }
  0xff   :  { %500 = vmatprep.subr.bf16.mxu1 %v533_v4 }
 0x102   :  { %501 = vmatpush3.bf16.msra.mxu1 %v336_v8 }
 0x103   :  { %502 = vmatprep.subr.bf16.mxu1 %v533_v4 }
 0x106   :  { %503 = vmatpush3.bf16.msra.mxu1 %v335_v9 }
 0x1a9   :  { %v215_v54 = vpop.f32.mrf.mxu1 }
 0x1aa   :  { %v216_v55 = vadd.f32 %v407_v52, %v215_v54 }
 0x1ab   :  { %v466_v57 = vpop.f32.mrf.mxu1 }
 0x1ac   :  { %v221_v58 = vmax.f32 %v216_v55, 0.0 }
 0x1ad   :  { %v218_v60 = vpop.f32.mrf.mxu1 }
 0x1ae   :  { %v227_v61 = vmul.f32 %v226_v56, %v221_v58 }
 0x1af   :  { %v467_v62 = vpop.f32.mrf.mxu1 }
 0x1b0   :  { %v232_v63 = vadd.f32 %v231_v59, %v227_v61 }
 0x1b2   :  { %v233_v1 = vmul.f32 %v232_v63, %v221_v58 }
 0x1b4   :  { %v238_v2 = vadd.f32 %v237_v0, %v233_v1 }
 0x1b6   :  { %v239_v5 = vmul.f32 %v238_v2, %v221_v58 }
 0x1b8   :  { %v244_v6 = vadd.f32 %v243_v3, %v239_v5 }
 0x1ba   :  { %v245_v7 = vpack.c.bf16 %v244_v6, %v244_v6 }
 0x1bc   :  { %485 = vmatmul.mubr.bf16.vlgmr.msra.gmra.mxu0 %v245_v7 }
 0x27c   :  { %v311_v11 = vpop.f32.mrf.mxu0 }
 0x27d   :  { %v312_v12 = vadd.f32 %v408_v10, %v311_v11 }
 0x27e   :  { %v486_v13 = vpop.f32.mrf.mxu0 }
 0x27f   :  { %v317_v14 = vmax.f32 %v312_v12, 0.0 }
 0x280   :  { %v314_v17 = vpop.f32.mrf.mxu0 }
 0x281   :  { %v318_v4 = vpack.c.bf16 %v317_v14, %v317_v14 }
 0x282   :  { %v487_v18 = vpop.f32.mrf.mxu0 }
 0x283   :  { %505 = vmatmul.mubr.bf16.vlgmr.msra.gmra.mxu1 %v318_v4 }
 0x343   :  { %v384_v20 = vpop.f32.mrf.mxu1 }
 0x344   :  { %v385_v22 = vadd.f32 %v409_v19, %v384_v20 }
 0x345   :  { %v506_v23 = vpop.f32.mrf.mxu1 }
 0x346   :  { %390 = vst [vmem:[#allocation2] sm:$0xff] %v385_v22 }
 0x347   :  { %v387_v24 = vpop.f32.mrf.mxu1 }
 0x348   :  { %522 = shalt.err (!%p519_p4)
}
 0x349   :  { %400 = dma.vmem_to_hbm [thread:$0]  %s398_s10, 128, %s850_s12, [#allocation3]   ;;  %v507_v25 = vpop.f32.mrf.mxu1 }
 0x34a   :  { %531 = dma.done.wait [#allocation3], 128  }
 0x34b   :  { %532 = vsyncadd [#allocation3], 4294967168 }
 0x34c   :  { %404 = vsyncpa [#allocation3], 1 }

</bundles_post_ra>
